<compile_context>
chip_gen: v5e
topology: v5e:2x2
jax: 0.10.0
libtpu: 0.0.40
codegen_flags: <defaults>
</compile_context>

<pallas_src>
import jax
import jax.numpy as jnp
from jax import lax
from jax.experimental import pallas as pl
from jax.experimental.pallas import tpu as pltpu
import numpy as np


def _make_lfc_kernel(H, W, c_half, c2, ouc):
    HW = H * W

    def kernel(x_ref, x2r_ref, pij_ref, wa_ref, wb_ref, bias_ref, o_ref):
        x = x_ref[0]            # (C, HW)    channel-major, HW lane-dense
        x2r = x2r_ref[0]        # (c2*H, W)  x2 half, per-channel image rows stacked

        # ---- x1 path: partial_conv3 (1x1, bias=False) pre-fused with proj + BN scale ----
        # z[o, :] = sum_c wA[o, c] * x1[c, :]     (wA = (w1 @ w3[:c_half]) * scale, transposed)
        z = wa_ref[:, 0:1] * x[0:1, :]
        for c in range(1, c_half):
            z = z + wa_ref[:, c:c + 1] * x[c:c + 1, :]

        # ---- _akconv (num_param=1, N=1): offsets are x2 itself ----
        off_x = x[c_half:c_half + 1, :]          # (1, HW)
        off_y = x[c_half + 1:c_half + 2, :]      # (1, HW)
        ii = pij_ref[0:1, :]                     # (1, HW) row coordinate of each pixel
        jj = pij_ref[1:2, :]                     # (1, HW) col coordinate of each pixel
        px = ii + off_x                          # p = p_0 + p_n(=0) + offset
        py = jj + off_y

        qltx = jnp.floor(px)
        qlty = jnp.floor(py)
        qrbx = qltx + 1.0
        qrby = qlty + 1.0
        pcx = jnp.clip(px, 0.0, float(H - 1))
        pcy = jnp.clip(py, 0.0, float(W - 1))

        # separable bilinear weights: g_lt = wx_lt*wy_lt, g_rb = wx_rb*wy_rb,
        # g_lb = wx_lt*wy_rb, g_rt = wx_rb*wy_lt  (unclamped q, clamped p, as in module)
        wx_lt = 1.0 + (qltx - pcx)
        wx_rb = 1.0 - (qrbx - pcx)
        wy_lt = 1.0 + (qlty - pcy)
        wy_rb = 1.0 - (qrby - pcy)

        # clamped integer corner coordinates (used only for the gather)
        r_lt = jnp.clip(qltx, 0.0, float(H - 1)).astype(jnp.int32)
        r_rb = jnp.clip(qrbx, 0.0, float(H - 1)).astype(jnp.int32)
        c_lt = jnp.clip(qlty, 0.0, float(W - 1)).astype(jnp.int32)
        c_rb = jnp.clip(qrby, 0.0, float(W - 1)).astype(jnp.int32)

        # column-combine mask (W, HW): at most two nonzeros per lane (output pixel)
        col_iota = lax.broadcasted_iota(jnp.int32, (W, HW), 0)
        ccomb = (jnp.where(col_iota == c_lt, wy_lt, 0.0)
                 + jnp.where(col_iota == c_rb, wy_rb, 0.0))

        # stage A (MXU): contract over the image column axis j
        #   z_rows[c*H + i, t] = sum_j x2[c, i, j] * ccomb[j, t]
        z_rows = jnp.dot(x2r, ccomb, preferred_element_type=jnp.float32)  # (c2*H, HW)

        # row-combine mask (H, HW)
        row_iota = lax.broadcasted_iota(jnp.int32, (H, HW), 0)
        rcomb = (jnp.where(row_iota == r_lt, wx_lt, 0.0)
                 + jnp.where(row_iota == r_rb, wx_rb, 0.0))

        # stage B (VPU+XLU): row selection + fused (akconv 1x1 conv @ proj @ BN scale)
        # x_off[c, t] = sum_i rcomb[i, t] * z_rows[c*H + i, t]
        # z[o, :]    += sum_c wB[o, c] * x_off[c, :]
        for c in range(c2):
            x_off_c = jnp.sum(rcomb * z_rows[c * H:(c + 1) * H, :],
                              axis=0, keepdims=True)          # (1, HW)
            z = z + wb_ref[:, c:c + 1] * x_off_c

        # ---- BN shift + SiLU ----
        z = z + bias_ref[...]                                  # (ouc, HW)
        o_ref[0] = (z * jax.nn.sigmoid(z)).astype(o_ref.dtype)

    return kernel


@jax.jit
def lfc_pallas(x_nchw, w1, w2, w3, scale, bias):
    B, C, H, W = x_nchw.shape
    HW = H * W
    c_half = C // 2
    c2 = C - c_half
    ouc = w3.shape[1]
    if c2 != 2:
        # TODO(synk): module only type-checks for N == 1 (dim_untouched == 2).
        raise NotImplementedError("LFC akconv branch requires dim_untouched == 2")

    # Channel-major slabs: only free reshapes / tiny slices on the host side.
    x_flat = x_nchw.reshape(B, C, HW)                                  # (B, C, HW)
    x2_rows = x_nchw[:, c_half:, :, :].reshape(B, c2 * H, W)           # (B, c2*H, W)

    # Precomputed p_0 grid (avoids per-element integer div/mod inside the kernel).
    ii = lax.broadcasted_iota(jnp.float32, (H, W), 0).reshape(1, HW)
    jj = lax.broadcasted_iota(jnp.float32, (H, W), 1).reshape(1, HW)
    pij = jnp.concatenate([ii, jj], axis=0)                            # (2, HW)

    # Fuse the three 1x1 convs + folded BN scale into two tiny weight matrices.
    #   proj(concat(x1 @ w1, x_off @ w2)) * scale = x1 @ wA + x_off @ wB
    scale_r = scale.reshape(1, ouc)
    wa = (w1 @ w3[:c_half, :]) * scale_r                               # (c_half, ouc)
    wb = (w2 @ w3[c_half:, :]) * scale_r                               # (c2, ouc)
    wa_t = wa.T                                                        # (ouc, c_half)
    wb_t = wb.T                                                        # (ouc, c2)
    bias_c = bias.reshape(ouc, 1)

    kernel = _make_lfc_kernel(H, W, c_half, c2, ouc)
    out = pl.pallas_call(
        kernel,
        out_shape=jax.ShapeDtypeStruct((B, ouc, HW), jnp.float32),
        grid=(B,),
        in_specs=[
            pl.BlockSpec((1, C, HW), lambda b: (b, 0, 0)),
            pl.BlockSpec((1, c2 * H, W), lambda b: (b, 0, 0)),
            pl.BlockSpec((2, HW), lambda b: (0, 0)),
            pl.BlockSpec((ouc, c_half), lambda b: (0, 0)),
            pl.BlockSpec((ouc, c2), lambda b: (0, 0)),
            pl.BlockSpec((ouc, 1), lambda b: (0, 0)),
        ],
        out_specs=pl.BlockSpec((1, ouc, HW), lambda b: (b, 0, 0)),
        compiler_params=pltpu.CompilerParams(dimension_semantics=("parallel",)),
    )(x_flat, x2_rows, pij, wa_t, wb_t, bias_c)

    return out.reshape(B, ouc, H, W)


def lfc_reference(x_nchw, w1, w2, w3, scale, bias):
    """Pure-JAX reference of the same forward pass (un-fused, for correctness check)."""
    B, C, H, W = x_nchw.shape
    c_half = C // 2
    x = jnp.transpose(x_nchw, (0, 2, 3, 1)).reshape(B, H * W, C)
    x1, x2 = x[..., :c_half], x[..., c_half:]
    y1 = x1 @ w1

    pos = jnp.arange(H * W)
    ii = (pos // W).astype(jnp.float32)[None, :]
    jj = (pos % W).astype(jnp.float32)[None, :]
    px = ii + x2[..., 0]
    py = jj + x2[..., 1]
    qltx, qlty = jnp.floor(px), jnp.floor(py)
    qrbx, qrby = qltx + 1.0, qlty + 1.0
    pcx = jnp.clip(px, 0.0, H - 1)
    pcy = jnp.clip(py, 0.0, W - 1)
    g_lt = (1 + (qltx - pcx)) * (1 + (qlty - pcy))
    g_rb = (1 - (qrbx - pcx)) * (1 - (qrby - pcy))
    g_lb = (1 + (qltx - pcx)) * (1 - (qrby - pcy))
    g_rt = (1 - (qrbx - pcx)) * (1 + (qlty - pcy))

    def gather(qx, qy):
        idx = (jnp.clip(qx, 0, H - 1).astype(jnp.int32) * W
               + jnp.clip(qy, 0, W - 1).astype(jnp.int32))
        idx = jnp.broadcast_to(idx[..., None], x2.shape)
        return jnp.take_along_axis(x2, idx, axis=1)

    x_off = (g_lt[..., None] * gather(qltx, qlty) + g_rb[..., None] * gather(qrbx, qrby)
             + g_lb[..., None] * gather(qltx, qrby) + g_rt[..., None] * gather(qrbx, qlty))
    y2 = x_off @ w2
    z = jnp.concatenate([y1, y2], axis=-1) @ w3
    z = z * scale + bias
    z = z * jax.nn.sigmoid(z)
    return jnp.transpose(z.reshape(B, H, W, -1), (0, 3, 1, 2))


if __name__ == "__main__":
    dim, ouc = 4, 8          # dim_conv3 = 2, dim_untouched = 2 (N = 1)
    B, H, W = 2, 16, 16
    c_half = dim // 2

    key = jax.random.PRNGKey(0)
    k1, k2, k3, k4, k5, kx = jax.random.split(key, 6)

    # Conv weights stored as (c_in, c_out).
    w1 = 0.5 * jax.random.normal(k1, (c_half, c_half), jnp.float32)              # partial_conv3
    w2 = 0.5 * jax.random.normal(k2, (dim - c_half, dim - c_half), jnp.float32)  # akconv 1x1 conv
    w3 = 0.5 * jax.random.normal(k3, (dim, ouc), jnp.float32)                    # proj conv

    # BatchNorm2d (eval semantics, running_mean=0, running_var=1, eps=1e-5), folded.
    gamma = 1.0 + 0.1 * jax.random.normal(k4, (1, ouc), jnp.float32)
    beta = 0.1 * jax.random.normal(k5, (1, ouc), jnp.float32)
    eps = 1e-5
    scale = gamma / jnp.sqrt(1.0 + eps)
    bias = beta

    x = jax.random.normal(kx, (B, dim, H, W), jnp.float32)

    out = lfc_pallas(x, w1, w2, w3, scale, bias)
    out = jax.block_until_ready(out)

    ref = lfc_reference(x, w1, w2, w3, scale, bias)
    np.testing.assert_allclose(np.asarray(out), np.asarray(ref), rtol=1e-4, atol=1e-4)
    assert out.shape == (B, ouc, H, W)

    print("KERNEL_OK")
</pallas_src>

<mosaic_0001>
module attributes {stable_mosaic.version = 11 : i64} {
  func.func @kernel(%arg0: i32, %arg1: memref<1x4x256xf32, #tpu.memory_space<vmem>>, %arg2: memref<1x32x16xf32, #tpu.memory_space<vmem>>, %arg3: memref<2x256xf32, #tpu.memory_space<vmem>>, %arg4: memref<8x2xf32, #tpu.memory_space<vmem>>, %arg5: memref<8x2xf32, #tpu.memory_space<vmem>>, %arg6: memref<8x1xf32, #tpu.memory_space<vmem>>, %arg7: memref<1x8x256xf32, #tpu.memory_space<vmem>>) attributes {dimension_semantics = [#tpu.dimension_semantics<parallel>], iteration_bounds = array<i64: 2>, scalar_prefetch = 0 : i64, scratch_operands = 0 : i64, tpu.core_type = #tpu.core_type<tc>, window_params = [{transform_indices = @transform_0, window_bounds = array<i64: 1, 4, 256>}, {transform_indices = @transform_1, window_bounds = array<i64: 1, 32, 16>}, {pipeline_mode = #tpu.pipeline_mode<synchronous>, transform_indices = @transform_2, window_bounds = array<i64: 2, 256>}, {pipeline_mode = #tpu.pipeline_mode<synchronous>, transform_indices = @transform_3, window_bounds = array<i64: 8, 2>}, {pipeline_mode = #tpu.pipeline_mode<synchronous>, transform_indices = @transform_4, window_bounds = array<i64: 8, 2>}, {pipeline_mode = #tpu.pipeline_mode<synchronous>, transform_indices = @transform_5, window_bounds = array<i64: 8, 1>}, {transform_indices = @transform_6, window_bounds = array<i64: 1, 8, 256>}]} {
    %c0 = arith.constant 0 : index
    %c0_0 = arith.constant 0 : index
    %c0_1 = arith.constant 0 : index
    %0 = vector.load %arg1[%c0, %c0_0, %c0_1] : memref<1x4x256xf32, #tpu.memory_space<vmem>>, vector<1x4x256xf32>
    %1 = vector.shape_cast %0 : vector<1x4x256xf32> to vector<4x256xf32>
    %c0_2 = arith.constant 0 : index
    %c0_3 = arith.constant 0 : index
    %c0_4 = arith.constant 0 : index
    %2 = vector.load %arg2[%c0_2, %c0_3, %c0_4] : memref<1x32x16xf32, #tpu.memory_space<vmem>>, vector<1x32x16xf32>
    %3 = vector.shape_cast %2 : vector<1x32x16xf32> to vector<32x16xf32>
    %c0_5 = arith.constant 0 : index
    %c0_6 = arith.constant 0 : index
    %4 = vector.load %arg4[%c0_5, %c0_6] : memref<8x2xf32, #tpu.memory_space<vmem>>, vector<8x1xf32>
    %5 = vector.extract_strided_slice %1 {offsets = [0, 0], sizes = [1, 256], strides = [1, 1]} : vector<4x256xf32> to vector<1x256xf32>
    %6 = vector.broadcast %4 : vector<8x1xf32> to vector<8x256xf32>
    %7 = vector.broadcast %5 : vector<1x256xf32> to vector<8x256xf32>
    %8 = arith.mulf %6, %7 : vector<8x256xf32>
    %c0_7 = arith.constant 0 : index
    %c1 = arith.constant 1 : index
    %9 = vector.load %arg4[%c0_7, %c1] : memref<8x2xf32, #tpu.memory_space<vmem>>, vector<8x1xf32>
    %10 = vector.extract_strided_slice %1 {offsets = [1, 0], sizes = [1, 256], strides = [1, 1]} : vector<4x256xf32> to vector<1x256xf32>
    %11 = vector.broadcast %9 : vector<8x1xf32> to vector<8x256xf32>
    %12 = vector.broadcast %10 : vector<1x256xf32> to vector<8x256xf32>
    %13 = arith.mulf %11, %12 : vector<8x256xf32>
    %14 = arith.addf %8, %13 : vector<8x256xf32>
    %15 = vector.extract_strided_slice %1 {offsets = [2, 0], sizes = [1, 256], strides = [1, 1]} : vector<4x256xf32> to vector<1x256xf32>
    %16 = vector.extract_strided_slice %1 {offsets = [3, 0], sizes = [1, 256], strides = [1, 1]} : vector<4x256xf32> to vector<1x256xf32>
    %c0_8 = arith.constant 0 : index
    %c0_9 = arith.constant 0 : index
    %17 = vector.load %arg3[%c0_8, %c0_9] : memref<2x256xf32, #tpu.memory_space<vmem>>, vector<1x256xf32>
    %c1_10 = arith.constant 1 : index
    %c0_11 = arith.constant 0 : index
    %18 = vector.load %arg3[%c1_10, %c0_11] : memref<2x256xf32, #tpu.memory_space<vmem>>, vector<1x256xf32>
    %19 = arith.addf %17, %15 : vector<1x256xf32>
    %20 = arith.addf %18, %16 : vector<1x256xf32>
    %21 = math.floor %19 : vector<1x256xf32>
    %22 = math.floor %20 : vector<1x256xf32>
    %cst = arith.constant 1.000000e+00 : f32
    %23 = vector.broadcast %cst : f32 to vector<1x256xf32>
    %24 = arith.addf %21, %23 : vector<1x256xf32>
    %cst_12 = arith.constant 1.000000e+00 : f32
    %25 = vector.broadcast %cst_12 : f32 to vector<1x256xf32>
    %26 = arith.addf %22, %25 : vector<1x256xf32>
    %cst_13 = arith.constant 0.000000e+00 : f32
    %cst_14 = arith.constant 1.500000e+01 : f32
    %27 = vector.broadcast %cst_13 : f32 to vector<1x256xf32>
    %28 = arith.maximumf %27, %19 : vector<1x256xf32>
    %29 = vector.broadcast %cst_14 : f32 to vector<1x256xf32>
    %30 = arith.minimumf %29, %28 : vector<1x256xf32>
    %cst_15 = arith.constant 0.000000e+00 : f32
    %cst_16 = arith.constant 1.500000e+01 : f32
    %31 = vector.broadcast %cst_15 : f32 to vector<1x256xf32>
    %32 = arith.maximumf %31, %20 : vector<1x256xf32>
    %33 = vector.broadcast %cst_16 : f32 to vector<1x256xf32>
    %34 = arith.minimumf %33, %32 : vector<1x256xf32>
    %35 = arith.subf %21, %30 : vector<1x256xf32>
    %cst_17 = arith.constant 1.000000e+00 : f32
    %36 = vector.broadcast %cst_17 : f32 to vector<1x256xf32>
    %37 = arith.addf %36, %35 : vector<1x256xf32>
    %38 = arith.subf %24, %30 : vector<1x256xf32>
    %cst_18 = arith.constant 1.000000e+00 : f32
    %39 = vector.broadcast %cst_18 : f32 to vector<1x256xf32>
    %40 = arith.subf %39, %38 : vector<1x256xf32>
    %41 = arith.subf %22, %34 : vector<1x256xf32>
    %cst_19 = arith.constant 1.000000e+00 : f32
    %42 = vector.broadcast %cst_19 : f32 to vector<1x256xf32>
    %43 = arith.addf %42, %41 : vector<1x256xf32>
    %44 = arith.subf %26, %34 : vector<1x256xf32>
    %cst_20 = arith.constant 1.000000e+00 : f32
    %45 = vector.broadcast %cst_20 : f32 to vector<1x256xf32>
    %46 = arith.subf %45, %44 : vector<1x256xf32>
    %cst_21 = arith.constant 0.000000e+00 : f32
    %cst_22 = arith.constant 1.500000e+01 : f32
    %47 = vector.broadcast %cst_21 : f32 to vector<1x256xf32>
    %48 = arith.maximumf %47, %21 : vector<1x256xf32>
    %49 = vector.broadcast %cst_22 : f32 to vector<1x256xf32>
    %50 = arith.minimumf %49, %48 : vector<1x256xf32>
    %51 = arith.fptosi %50 : vector<1x256xf32> to vector<1x256xi32>
    %cst_23 = arith.constant 0.000000e+00 : f32
    %cst_24 = arith.constant 1.500000e+01 : f32
    %52 = vector.broadcast %cst_23 : f32 to vector<1x256xf32>
    %53 = arith.maximumf %52, %24 : vector<1x256xf32>
    %54 = vector.broadcast %cst_24 : f32 to vector<1x256xf32>
    %55 = arith.minimumf %54, %53 : vector<1x256xf32>
    %56 = arith.fptosi %55 : vector<1x256xf32> to vector<1x256xi32>
    %cst_25 = arith.constant 0.000000e+00 : f32
    %cst_26 = arith.constant 1.500000e+01 : f32
    %57 = vector.broadcast %cst_25 : f32 to vector<1x256xf32>
    %58 = arith.maximumf %57, %22 : vector<1x256xf32>
    %59 = vector.broadcast %cst_26 : f32 to vector<1x256xf32>
    %60 = arith.minimumf %59, %58 : vector<1x256xf32>
    %61 = arith.fptosi %60 : vector<1x256xf32> to vector<1x256xi32>
    %cst_27 = arith.constant 0.000000e+00 : f32
    %cst_28 = arith.constant 1.500000e+01 : f32
    %62 = vector.broadcast %cst_27 : f32 to vector<1x256xf32>
    %63 = arith.maximumf %62, %26 : vector<1x256xf32>
    %64 = vector.broadcast %cst_28 : f32 to vector<1x256xf32>
    %65 = arith.minimumf %64, %63 : vector<1x256xf32>
    %66 = arith.fptosi %65 : vector<1x256xf32> to vector<1x256xi32>
    %67 = tpu.iota {dimensions = array<i32: 0>} : vector<16x256xi32>
    %68 = vector.broadcast %61 : vector<1x256xi32> to vector<16x256xi32>
    %69 = arith.cmpi eq, %67, %68 : vector<16x256xi32>
    %cst_29 = arith.constant 0.000000e+00 : f32
    %70 = vector.shape_cast %43 : vector<1x256xf32> to vector<1x256xf32>
    %71 = vector.broadcast %70 : vector<1x256xf32> to vector<16x256xf32>
    %72 = vector.broadcast %cst_29 : f32 to vector<16x256xf32>
    %73 = arith.select %69, %71, %72 : vector<16x256xi1>, vector<16x256xf32>
    %74 = vector.broadcast %66 : vector<1x256xi32> to vector<16x256xi32>
    %75 = arith.cmpi eq, %67, %74 : vector<16x256xi32>
    %cst_30 = arith.constant 0.000000e+00 : f32
    %76 = vector.shape_cast %46 : vector<1x256xf32> to vector<1x256xf32>
    %77 = vector.broadcast %76 : vector<1x256xf32> to vector<16x256xf32>
    %78 = vector.broadcast %cst_30 : f32 to vector<16x256xf32>
    %79 = arith.select %75, %77, %78 : vector<16x256xi1>, vector<16x256xf32>
    %80 = arith.addf %73, %79 : vector<16x256xf32>
    %cst_31 = arith.constant dense<0.000000e+00> : vector<32x256xf32>
    %81 = tpu.matmul %3, %80, %cst_31 {dimension_numbers = #tpu.dot_dimension_numbers<[1], [0], [0], [1], [0, 0, 1, 1], [], []>} : vector<32x16xf32>, vector<16x256xf32>, vector<32x256xf32> -> vector<32x256xf32>
    %82 = tpu.iota {dimensions = array<i32: 0>} : vector<16x256xi32>
    %83 = vector.broadcast %51 : vector<1x256xi32> to vector<16x256xi32>
    %84 = arith.cmpi eq, %82, %83 : vector<16x256xi32>
    %cst_32 = arith.constant 0.000000e+00 : f32
    %85 = vector.shape_cast %37 : vector<1x256xf32> to vector<1x256xf32>
    %86 = vector.broadcast %85 : vector<1x256xf32> to vector<16x256xf32>
    %87 = vector.broadcast %cst_32 : f32 to vector<16x256xf32>
    %88 = arith.select %84, %86, %87 : vector<16x256xi1>, vector<16x256xf32>
    %89 = vector.broadcast %56 : vector<1x256xi32> to vector<16x256xi32>
    %90 = arith.cmpi eq, %82, %89 : vector<16x256xi32>
    %cst_33 = arith.constant 0.000000e+00 : f32
    %91 = vector.shape_cast %40 : vector<1x256xf32> to vector<1x256xf32>
    %92 = vector.broadcast %91 : vector<1x256xf32> to vector<16x256xf32>
    %93 = vector.broadcast %cst_33 : f32 to vector<16x256xf32>
    %94 = arith.select %90, %92, %93 : vector<16x256xi1>, vector<16x256xf32>
    %95 = arith.addf %88, %94 : vector<16x256xf32>
    %96 = vector.extract_strided_slice %81 {offsets = [0, 0], sizes = [16, 256], strides = [1, 1]} : vector<32x256xf32> to vector<16x256xf32>
    %97 = arith.mulf %95, %96 : vector<16x256xf32>
    %cst_34 = arith.constant dense<0.000000e+00> : vector<256xf32>
    %98 = vector.multi_reduction <add>, %97, %cst_34 [0] : vector<16x256xf32> to vector<256xf32>
    %99 = vector.shape_cast %98 : vector<256xf32> to vector<1x256xf32>
    %c0_35 = arith.constant 0 : index
    %c0_36 = arith.constant 0 : index
    %100 = vector.load %arg5[%c0_35, %c0_36] : memref<8x2xf32, #tpu.memory_space<vmem>>, vector<8x1xf32>
    %101 = vector.broadcast %100 : vector<8x1xf32> to vector<8x256xf32>
    %102 = vector.broadcast %99 : vector<1x256xf32> to vector<8x256xf32>
    %103 = arith.mulf %101, %102 : vector<8x256xf32>
    %104 = arith.addf %14, %103 : vector<8x256xf32>
    %105 = vector.extract_strided_slice %81 {offsets = [16, 0], sizes = [16, 256], strides = [1, 1]} : vector<32x256xf32> to vector<16x256xf32>
    %106 = arith.mulf %95, %105 : vector<16x256xf32>
    %cst_37 = arith.constant dense<0.000000e+00> : vector<256xf32>
    %107 = vector.multi_reduction <add>, %106, %cst_37 [0] : vector<16x256xf32> to vector<256xf32>
    %108 = vector.shape_cast %107 : vector<256xf32> to vector<1x256xf32>
    %c0_38 = arith.constant 0 : index
    %c1_39 = arith.constant 1 : index
    %109 = vector.load %arg5[%c0_38, %c1_39] : memref<8x2xf32, #tpu.memory_space<vmem>>, vector<8x1xf32>
    %110 = vector.broadcast %109 : vector<8x1xf32> to vector<8x256xf32>
    %111 = vector.broadcast %108 : vector<1x256xf32> to vector<8x256xf32>
    %112 = arith.mulf %110, %111 : vector<8x256xf32>
    %113 = arith.addf %104, %112 : vector<8x256xf32>
    %c0_40 = arith.constant 0 : index
    %c0_41 = arith.constant 0 : index
    %114 = vector.load %arg6[%c0_40, %c0_41] : memref<8x1xf32, #tpu.memory_space<vmem>>, vector<8x1xf32>
    %115 = vector.broadcast %114 : vector<8x1xf32> to vector<8x256xf32>
    %116 = arith.addf %113, %115 : vector<8x256xf32>
    %117 = arith.negf %116 : vector<8x256xf32>
    %118 = math.exp %117 : vector<8x256xf32>
    %cst_42 = arith.constant 1.000000e+00 : f32
    %119 = vector.broadcast %cst_42 : f32 to vector<8x256xf32>
    %120 = arith.addf %119, %118 : vector<8x256xf32>
    %121 = arith.divf %119, %120 : vector<8x256xf32>
    %122 = arith.mulf %116, %121 : vector<8x256xf32>
    %c0_43 = arith.constant 0 : index
    %c0_44 = arith.constant 0 : index
    %c0_45 = arith.constant 0 : index
    %123 = vector.load %arg7[%c0_43, %c0_44, %c0_45] : memref<1x8x256xf32, #tpu.memory_space<vmem>>, vector<1x8x256xf32>
    %124 = vector.shape_cast %123 : vector<1x8x256xf32> to vector<8x256xf32>
    %125 = vector.shape_cast %122 : vector<8x256xf32> to vector<1x8x256xf32>
    tpu.vector_store %arg7[%c0_43, %c0_44, %c0_45], %125 {strides = array<i32>} : memref<1x8x256xf32, #tpu.memory_space<vmem>>, vector<1x8x256xf32>,
    return
  }
  func.func @transform_0(%arg0: i32) -> (i32, i32, i32) {
    %c0_i32 = arith.constant 0 : i32
    %c0_i32_0 = arith.constant 0 : i32
    %c0_i32_1 = arith.constant 0 : i32
    return %arg0, %c0_i32, %c0_i32_0 : i32, i32, i32
  }
  func.func @transform_1(%arg0: i32) -> (i32, i32, i32) {
    %c0_i32 = arith.constant 0 : i32
    %c0_i32_0 = arith.constant 0 : i32
    %c0_i32_1 = arith.constant 0 : i32
    return %arg0, %c0_i32, %c0_i32_0 : i32, i32, i32
  }
  func.func @transform_2(%arg0: i32) -> (i32, i32) {
    %c0_i32 = arith.constant 0 : i32
    %c0_i32_0 = arith.constant 0 : i32
    %c0_i32_1 = arith.constant 0 : i32
    return %c0_i32, %c0_i32_0 : i32, i32
  }
  func.func @transform_3(%arg0: i32) -> (i32, i32) {
    %c0_i32 = arith.constant 0 : i32
    %c0_i32_0 = arith.constant 0 : i32
    %c0_i32_1 = arith.constant 0 : i32
    return %c0_i32, %c0_i32_0 : i32, i32
  }
  func.func @transform_4(%arg0: i32) -> (i32, i32) {
    %c0_i32 = arith.constant 0 : i32
    %c0_i32_0 = arith.constant 0 : i32
    %c0_i32_1 = arith.constant 0 : i32
    return %c0_i32, %c0_i32_0 : i32, i32
  }
  func.func @transform_5(%arg0: i32) -> (i32, i32) {
    %c0_i32 = arith.constant 0 : i32
    %c0_i32_0 = arith.constant 0 : i32
    %c0_i32_1 = arith.constant 0 : i32
    return %c0_i32, %c0_i32_0 : i32, i32
  }
  func.func @transform_6(%arg0: i32) -> (i32, i32, i32) {
    %c0_i32 = arith.constant 0 : i32
    %c0_i32_0 = arith.constant 0 : i32
    %c0_i32_1 = arith.constant 0 : i32
    return %arg0, %c0_i32, %c0_i32_0 : i32, i32, i32
  }
}

</mosaic_0001>

<bundles_post_ra>
// kernel: lfc_pallas.1
= control target key start
LH: loop header
LB: loop body
LE: loop exit
PB: predicated region body
PF: predicated region fallthrough
CT: control target
= control target key end

     0   :  { %s774_s21 = smov 0   ;;  %s858_s0 = inlined_call_operand.vmem [shape: f32[2,4,256], index: 0, kind: input, shape index: {}]   ;;  %s859_s1 = inlined_call_operand.vmem [shape: f32[2,32,16], index: 1, kind: input, shape index: {}]   ;;  %s860_s2 = inlined_call_operand.vmem [shape: f32[2,256], index: 2, kind: input, shape index: {}]   ;;  %s861_s3 = inlined_call_operand.vmem [shape: f32[8,2], index: 3, kind: input, shape index: {}]   ;;  %s862_s4 = inlined_call_operand.vmem [shape: f32[8,2], index: 4, kind: input, shape index: {}]   ;;  %s863_s5 = inlined_call_operand.vmem [shape: f32[8,1], index: 5, kind: input, shape index: {}]   ;;  %s864_s6 = inlined_call_operand.vmem [shape: f32[2,8,256], index: 6, kind: output, shape index: {}]  }
   0x1 LB: > { %s660_s22 = sadd.s32 4294967295, %s735_s21   ;;  %p664_p0 = scmp.ge.s32.totalorder %s735_s21, 1  ;;  %s735_s21 = sphi %s774_s21, %s16_s21  }
   0x2   : > { %p222_p1 = scmp.lt.s32.totalorder %s735_s21, 3 }
   0x4   : > { %p223_p2 = pnand %p664_p0, %p222_p1 }
   0x5   : > { %p257_p3 = scmp.lt.s32.totalorder (!%p223_p2), %s660_s22, 1 }
   0x6   : > { %226 = sbr.rel (%p223_p2) target bundleno = 250 (0xfa), region = 44 }
   0xb   : > { %s866_s22 = smov (!%p257_p3, %s660_s22), 1  ;;  %v671_v2 = vld [vmem:[%s860_s2 + $0x1] ss:$2 sm:$0x3]  ;;  %v347_v5 = vlaneseq  ;;  %v737_v10 = vmov 0   ;;  %v738_v32 = vmov 1  }
   0xc   : > { %s684_s23 = sshll.u32 %s866_s22, 3  ;;  %v277_v8 = vld [vmem:[%s861_s3] sm:$0xff]  ;;  %715 = vset.pattern.permute.xlu0 %v737_v10  ;;  %717 = vset.pattern.permute.xlu1 %v737_v10  ;;  %s685_s11 = sshll.u32 %s866_s22, 5  ;;  %vm384_vm9 = vcmask 130048  }
   0xd   : > { %s261_s26 = scalar_lea.vmem %s858_s0, %s684_s23  ;;  %v507_v9 = vld [vmem:[%s862_s4] sm:$0xff]  ;;  %280 = vperm.xlu0 %715, %v277_v8   ;;  %v808_v15 = vshrl.u32 %v347_v5, 7  ;;  %719 = vset.pattern.permute.xlu2 %v737_v10  ;;  %s266_s14 = scalar_lea.vmem %s859_s1, %s685_s11 }
   0xe   : > { %v788_v0 = vld [vmem:[%s261_s26] sm:$0xff]  ;;  %510 = vperm.xlu1 %717, %v507_v9   ;;  %v275_v51 = vld [vmem:[%s266_s14 + $0x10] sm:$0xff]  ;;  %v274_v52 = vld [vmem:[%s266_s14 + $0x8] sm:$0xff]  ;;  %s686_s17 = sshll.u32 %s866_s22, 4 }
   0xf   : > { %309 = vst [vmem:[#allocation1] sm:$0xff] %v788_v0  ;;  %v543_v11 = vld [vmem:[%s863_s5] sm:$0xff]  ;;  %v812_v24 = vadd.s32 8, %v808_v15  ;;  %v276_v53 = vld [vmem:[%s266_s14 + $0x18] sm:$0xff]  ;;  %s271_s20 = scalar_lea.vmem %s864_s6, %s686_s17 }
  0x10   : > { %546 = vperm.xlu2 %719, %v543_v11   ;;  %v273_v50 = vld [vmem:[%s266_s14] sm:$0xff] }
  0x11   : > { %v306_v54 = vld [vmem:[%s860_s2] ss:$2 sm:$0x3] }
  0x15   : > { %716 = vset.pattern.permute.xlu0 %v738_v32 }
  0x16   : > { %v791_v1 = vld [vmem:[#allocation1 + $0x2] ss:$4 sm:$0xff]  ;;  %718 = vset.pattern.permute.xlu1 %v738_v32  ;;  %293 = vperm.xlu0 %716, %v277_v8  }
  0x17   : > { %314 = vst [vmem:[#allocation1] sm:$0xff] %v788_v0  ;;  %536 = vperm.xlu1 %718, %v507_v9   ;;  %v313_v55 = vadd.f32 %v791_v1, %v306_v54  ;;  %v284_v54 = vperm.slane %v788_v0, 0 }
  0x19   : > { %v319_v56 = vfloor.f32 %v313_v55  ;;  %v323_v60 = vmax.f32 %v313_v55, 0.0 }
  0x1b   : > { %v321_v57 = vadd.f32 1.0, %v319_v56  ;;  %v335_v61 = vmax.f32 %v319_v56, 0.0 }
  0x1d   : > { %v338_v58 = vmax.f32 %v321_v57, 0.0 }
  0x1e   : > { %v316_v3 = vld [vmem:[#allocation1 + $0x3] ss:$4 sm:$0xff]  ;;  %720 = vset.pattern.permute.xlu0 %v737_v10 }
  0x1f   : > { %v318_v4 = vadd.f32 %v671_v2, %v316_v3  ;;  %v339_v59 = vmin.f32 %v338_v58, 15.0  ;;  %v324_v2 = vmin.f32 %v323_v60, 15.0  ;;  %v336_v3 = vmin.f32 %v335_v61, 15.0 }
  0x20   : > { %v285_v58 = vperm.slane %v788_v0, 4  ;;  %v297_v60 = vperm.slane %v788_v0, 5 }
  0x21   : > { %v320_v6 = vfloor.f32 %v318_v4  ;;  %v325_v7 = vmax.f32 %v318_v4, 0.0  ;;  %v694_v62 = vceil.f32 %v339_v59  ;;  %v695_v63 = vfloor.f32 %v339_v59 }
  0x22   : > { %vm693_vm10 = vcmp.lt.s32.totalorder %v339_v59, 0  ;;  %v327_v5 = vsub.f32 %v319_v56, %v324_v2  ;;  %v296_v56 = vperm.slane %v788_v0, 1 }
  0x23   : > { %v322_v12 = vadd.f32 1.0, %v320_v6  ;;  %v326_v13 = vmin.f32 %v325_v7, 15.0  ;;  %v341_v14 = vmax.f32 %v320_v6, 0.0  ;;  %v696_v4 = vsel %vm693_vm10, %v694_v62, %v695_v63 }
  0x24   : > { %v692_v7 = vcvt.f32.s32 %v336_v3  ;;  %v697_v8 = vcvt.f32.s32 %v696_v4  ;;  %v328_v9 = vadd.f32 1.0, %v327_v5  ;;  %v288_v4 = vperm.slane %v284_v54, 0 }
  0x25   : > { %v331_v16 = vsub.f32 %v320_v6, %v326_v13  ;;  %v333_v17 = vsub.f32 %v322_v12, %v326_v13  ;;  %v342_v18 = vmin.f32 %v341_v14, 15.0  ;;  %v344_v19 = vmax.f32 %v322_v12, 0.0 }
  0x26   : > { %v329_v6 = vsub.f32 %v321_v57, %v324_v2  ;;  %v455_v11 = vperm.slane %v692_v7, 0  ;;  %v470_v1 = vperm.slane %v697_v8, 0  ;;  %v456_v12 = vperm.slane %v692_v7, 1 }
  0x27   : > { %v332_v20 = vadd.f32 1.0, %v331_v16  ;;  %v699_v21 = vcvt.f32.s32 %v342_v18  ;;  %v345_v22 = vmin.f32 %v344_v19, 15.0  ;;  %v334_v23 = vsub.f32 1.0, %v333_v17 }
  0x28   : > { %v330_v10 = vsub.f32 1.0, %v329_v6  ;;  %v471_v13 = vperm.slane %v697_v8, 1  ;;  %v462_v14 = vperm.slane %v328_v9, 0  ;;  %v463_v17 = vperm.slane %v328_v9, 1 }
  0x29   : > { %vm700_vm0 = vcmp.lt.s32.totalorder %v345_v22, 0  ;;  %v701_v25 = vceil.f32 %v345_v22  ;;  %v702_v26 = vfloor.f32 %v345_v22  ;;  %v350_v27 = vperm.slane %v699_v21, 0 }
  0x2a   : > { %v351_v28 = vperm.slane %v699_v21, 1  ;;  %v357_v30 = vperm.slane %v332_v20, 0  ;;  %v358_v31 = vperm.slane %v332_v20, 1  ;;  %v372_v34 = vperm.slane %v334_v23, 0 }
  0x2b   : > { %v703_v29 = vsel %vm700_vm0, %v701_v25, %v702_v26  ;;  %vm354_vm1 = vcmp.eq.s32.totalorder %v812_v24, %v350_v27  ;;  %vm352_vm3 = vcmp.eq.s32.totalorder %v808_v15, %v350_v27  ;;  %v373_v35 = vperm.slane %v334_v23, 1 }
  0x2c   : > { %v704_v33 = vcvt.f32.s32 %v703_v29  ;;  %vm355_vm2 = vcmp.eq.s32.totalorder %v812_v24, %v351_v28  ;;  %vm353_vm4 = vcmp.eq.s32.totalorder %v808_v15, %v351_v28  ;;  %v363_v38 = vsel %vm354_vm1, %v357_v30, 0.0 }
  0x2d   : > { %v364_v39 = vsel %vm355_vm2, %v358_v31, 0.0  ;;  %v361_v40 = vsel %vm352_vm3, %v357_v30, 0.0  ;;  %v362_v41 = vsel %vm353_vm4, %v358_v31, 0.0  ;;  %v477_v16 = vperm.slane %v330_v10, 0 }
  0x2e   : > { %v365_v36 = vperm.slane %v704_v33, 0  ;;  %v366_v37 = vperm.slane %v704_v33, 1  ;;  %v478_v18 = vperm.slane %v330_v10, 1  ;;  %vm457_vm11 = vcmp.eq.s32.totalorder %v808_v15, %v455_v11 }
  0x2f   : > { %vm472_vm12 = vcmp.eq.s32.totalorder %v808_v15, %v470_v1  ;;  %vm459_vm13 = vcmp.eq.s32.totalorder %v812_v24, %v455_v11  ;;  %vm474_vm14 = vcmp.eq.s32.totalorder %v812_v24, %v470_v1  ;;  %vm458_vm15 = vcmp.eq.s32.totalorder %v808_v15, %v456_v12 }
  0x30   : > { %vm369_vm5 = vcmp.eq.s32.totalorder %v812_v24, %v365_v36  ;;  %vm370_vm6 = vcmp.eq.s32.totalorder %v812_v24, %v366_v37  ;;  %vm367_vm7 = vcmp.eq.s32.totalorder %v808_v15, %v365_v36  ;;  %vm368_vm8 = vcmp.eq.s32.totalorder %v808_v15, %v366_v37 }
  0x31   : > { %v378_v42 = vsel %vm369_vm5, %v372_v34, 0.0  ;;  %v379_v43 = vsel %vm370_vm6, %v373_v35, 0.0  ;;  %v376_v44 = vsel %vm367_vm7, %v372_v34, 0.0  ;;  %v377_v45 = vsel %vm368_vm8, %v373_v35, 0.0 }
  0x32   : > { %v382_v46 = vadd.f32 %v378_v42, %v363_v38  ;;  %v383_v47 = vadd.f32 %v379_v43, %v364_v39  ;;  %v380_v48 = vadd.f32 %v376_v44, %v361_v40  ;;  %v381_v49 = vadd.f32 %v377_v45, %v362_v41 }
  0x33   : > { %vm473_vm0 = vcmp.eq.s32.totalorder %v808_v15, %v471_v13  ;;  %vm460_vm1 = vcmp.eq.s32.totalorder %v812_v24, %v456_v12  ;;  %vm475_vm2 = vcmp.eq.s32.totalorder %v812_v24, %v471_v13  ;;  %v466_v21 = vsel %vm457_vm11, %v462_v14, 0.0 }
  0x34   : > { %411 = vmatpush.msra.mxu0 %v382_v46  ;;  %687 = vmatpush.msra.mxu2 %v382_v46  ;;  %v481_v22 = vsel %vm472_vm12, %v477_v16, 0.0  ;;  %v468_v23 = vsel %vm459_vm13, %v462_v14, 0.0  ;;  %v483_v25 = vsel %vm474_vm14, %v477_v16, 0.0  ;;  %v467_v26 = vsel %vm458_vm15, %v463_v17, 0.0 }
  0x35   : > { %440 = vmatpush.msra.mxu1 %v383_v47  ;;  %689 = vmatpush.msra.mxu3 %v383_v47  ;;  %v482_v27 = vsel %vm473_vm0, %v478_v18, 0.0  ;;  %v469_v28 = vsel %vm460_vm1, %v463_v17, 0.0  ;;  %v484_v29 = vsel %vm475_vm2, %v478_v18, 0.0  ;;  %v485_v30 = vadd.f32 %v481_v22, %v466_v21 }
  0x36   : > { %412 = vmatpush.msra.mxu0 %v380_v48  ;;  %688 = vmatpush.msra.mxu2 %v380_v48  ;;  %v487_v31 = vadd.f32 %v483_v25, %v468_v23  ;;  %v486_v32 = vadd.f32 %v482_v27, %v467_v26  ;;  %v488_v34 = vadd.f32 %v484_v29, %v469_v28  ;;  %v300_v6 = vperm.slane %v296_v56, 1 }
  0x37   : > { %441 = vmatpush.msra.mxu1 %v381_v49  ;;  %690 = vmatpush.msra.mxu3 %v381_v49  ;;  %v289_v8 = vperm.slane %v285_v58, 0  ;;  %v301_v11 = vperm.slane %v297_v60, 1 }
  0x38   : > { %672 = vmatmul.msk.f32.vlgmr.msra.gmra.mxu0 %vm384_vm9, %v273_v50  ;;  %674 = vmatmul.msk.f32.vlgmr.msra.gmra.mxu2 %vm384_vm9, %v275_v51 }
  0x39   : > { %676 = vmatmul.msk.f32.vlgmr.msra.gmra.mxu1 %vm384_vm9, %v273_v50  ;;  %678 = vmatmul.msk.f32.vlgmr.msra.gmra.mxu3 %vm384_vm9, %v275_v51 }
  0x40   : > { %673 = vmatmul.msk.f32.gmra.mxu0 %vm384_vm9, %v274_v52  ;;  %675 = vmatmul.msk.f32.gmra.mxu2 %vm384_vm9, %v276_v53 }
  0x41   : > { %677 = vmatmul.msk.f32.gmra.mxu1 %vm384_vm9, %v274_v52  ;;  %679 = vmatmul.msk.f32.gmra.mxu3 %vm384_vm9, %v276_v53 }
  0x7f   : > { %v281_v42 = vpop.permute.xlu0 %280 }
  0x80   : > { %v511_v61 = vpop.permute.xlu1 %510  ;;  %v290_v17 = vmul.f32 %v288_v4, %v281_v42 }
  0x88   : > { %v294_v10 = vpop.permute.xlu0 %293 }
  0x89   : > { %v302_v0 = vmul.f32 %v300_v6, %v294_v10  ;;  %v537_v26 = vpop.permute.xlu1 %536 }
  0x8b   : > { %v304_v28 = vadd.f32 %v302_v0, %v290_v17 }
  0xb5   : > { %v414_v19 = vpop.f32.mrf.mxu0 }
  0xb6   : > { %v443_v20 = vpop.f32.mrf.mxu1  ;;  %v489_v36 = vmul.f32 %v485_v30, %v414_v19  ;;  %v291_v19 = vmul.f32 %v289_v8, %v281_v42 }
  0xb7   : > { %v490_v24 = vmul.f32 %v486_v32, %v443_v20  ;;  %v303_v20 = vmul.f32 %v301_v11, %v294_v10 }
  0xbb   : > { %v420_v33 = vpop.f32.mrf.mxu2 }
  0xbc   : > { %v449_v35 = vpop.f32.mrf.mxu3  ;;  %v517_v46 = vmul.f32 %v485_v30, %v420_v33  ;;  %v305_v30 = vadd.f32 %v303_v20, %v291_v19 }
  0xbd   : > { %v417_v15 = vpop.f32.mrf.mxu0  ;;  %v518_v50 = vmul.f32 %v486_v32, %v449_v35 }
  0xbe   : > { %v491_v37 = vmul.f32 %v487_v31, %v417_v15  ;;  %v446_v38 = vpop.f32.mrf.mxu1  ;;  %v547_v15 = vpop.permute.xlu2 %546 }
  0xbf   : > { %v492_v39 = vmul.f32 %v488_v34, %v446_v38 }
  0xc0   : > { %v493_v40 = vadd.f32 %v491_v37, %v489_v36 }
  0xc1   : > { %v500_v41 = vadd.f32 %v492_v39, %v490_v24 }
  0xc2   : > { %v494_v43 = vrot.slane %v493_v40, 4 }
  0xc3   : > { %v501_v44 = vrot.slane %v500_v41, 4  ;;  %v423_v45 = vpop.f32.mrf.mxu2 }
  0xc4   : > { %v495_v47 = vadd.f32 %v494_v43, %v493_v40  ;;  %v519_v48 = vmul.f32 %v487_v31, %v423_v45  ;;  %v452_v49 = vpop.f32.mrf.mxu3 }
  0xc5   : > { %v502_v51 = vadd.f32 %v501_v44, %v500_v41  ;;  %v520_v52 = vmul.f32 %v488_v34, %v452_v49 }
  0xc6   : > { %v496_v53 = vrot.slane %v495_v47, 2  ;;  %v521_v55 = vadd.f32 %v519_v48, %v517_v46 }
  0xc7   : > { %v503_v57 = vrot.slane %v502_v51, 2  ;;  %v528_v59 = vadd.f32 %v520_v52, %v518_v50 }
  0xc8   : > { %v522_v62 = vrot.slane %v521_v55, 4  ;;  %v497_v63 = vadd.f32 %v496_v53, %v495_v47 }
  0xc9   : > { %v529_v2 = vrot.slane %v528_v59, 4  ;;  %v504_v3 = vadd.f32 %v503_v57, %v502_v51 }
  0xca   : > { %v523_v5 = vadd.f32 %v522_v62, %v521_v55  ;;  %v498_v7 = vrot.slane %v497_v63, 1 }
  0xcb   : > { %v530_v9 = vadd.f32 %v529_v2, %v528_v59  ;;  %v505_v1 = vrot.slane %v504_v3, 1 }
  0xcc   : > { %v499_v12 = vadd.f32 %v498_v7, %v497_v63  ;;  %v524_v13 = vrot.slane %v523_v5, 2 }
  0xcd   : > { %v506_v14 = vadd.f32 %v505_v1, %v504_v3  ;;  %v531_v16 = vrot.slane %v530_v9, 2 }
  0xce   : > { %v525_v18 = vadd.f32 %v524_v13, %v523_v5  ;;  %v513_v22 = vmul.f32 %v511_v61, %v499_v12 }
  0xcf   : > { %v532_v21 = vadd.f32 %v531_v16, %v530_v9  ;;  %v514_v25 = vmul.f32 %v511_v61, %v506_v14 }
  0xd0   : > { %v526_v23 = vrot.slane %v525_v18, 1  ;;  %v515_v32 = vadd.f32 %v513_v22, %v304_v28 }
  0xd1   : > { %v533_v27 = vrot.slane %v532_v21, 1  ;;  %v516_v34 = vadd.f32 %v514_v25, %v305_v30 }
  0xd2   : > { %v527_v29 = vadd.f32 %v526_v23, %v525_v18 }
  0xd3   : > { %v534_v31 = vadd.f32 %v533_v27, %v532_v21 }
  0xd4   : > { %v539_v33 = vmul.f32 %v537_v26, %v527_v29 }
  0xd5   : > { %v540_v35 = vmul.f32 %v537_v26, %v534_v31 }
  0xd6   : > { %v541_v36 = vadd.f32 %v539_v33, %v515_v32 }
  0xd7   : > { %v542_v37 = vadd.f32 %v540_v35, %v516_v34 }
  0xd8   : > { %v549_v38 = vadd.f32 %v547_v15, %v541_v36 }
  0xd9   : > { %v550_v24 = vadd.f32 %v547_v15, %v542_v37 }
  0xda   : > { %v680_v39 = vmul.f32 -1.442695, %v549_v38 }
  0xdb   : > { %v681_v40 = vmul.f32 -1.442695, %v550_v24 }
  0xdc   : > { %721 = vpow2.f32 %v680_v39 }
  0xdd   : > { %723 = vpow2.f32 %v681_v40 }
  0xe2   : > { %v722_v41 = vpop.eup %721 }
  0xe3   : > { %v724_v42 = vpop.eup %723  ;;  %v557_v43 = vadd.f32 1.0, %v722_v41 }
  0xe4   : > { %v558_v44 = vadd.f32 1.0, %v724_v42 }
  0xe5   : > { %725 = vrcp.f32 %v557_v43  ;;  %v570_v50 = vand.u32 2147483648, %v557_v43  ;;  %v568_v53 = vand.u32 2147483647, %v557_v43  ;;  %vm564_vm5 = vweird.f32 %v557_v43 }
  0xe6   : > { %727 = vrcp.f32 %v558_v44  ;;  %v585_v54 = vand.u32 2147483648, %v558_v44  ;;  %v583_v56 = vand.u32 2147483647, %v558_v44  ;;  %vm579_vm7 = vweird.f32 %v558_v44 }
  0xe7   : > { %v571_v58 = vor.u32 1.1754944e-38, %v570_v50  ;;  %vm569_vm8 = vcmp.eq.f32.partialorder %v568_v53, 8.507059e+37 }
  0xe8   : > { %v586_v61 = vor.u32 1.1754944e-38, %v585_v54  ;;  %vm584_vm10 = vcmp.eq.f32.partialorder %v583_v56, 8.507059e+37 }
  0xeb   : > { %v726_v45 = vpop.eup %725 }
  0xec   : > { %v728_v46 = vpop.eup %727  ;;  %v560_v47 = vmul.f32 %v726_v45, %v557_v43  ;;  %vm565_vm3 = vweird.f32 %v726_v45 }
  0xed   : > { %v575_v48 = vmul.f32 %v728_v46, %v558_v44  ;;  %vm580_vm4 = vweird.f32 %v728_v46  ;;  %vm566_vm6 = vmor %vm564_vm5, %vm565_vm3 }
  0xee   : > { %v561_v49 = vsub.f32 1.0, %v560_v47  ;;  %vm581_vm9 = vmor %vm579_vm7, %vm580_vm4 }
  0xef   : > { %v576_v51 = vsub.f32 1.0, %v575_v48 }
  0xf0   : > { %v562_v52 = vmul.f32 %v726_v45, %v561_v49 }
  0xf1   : > { %v577_v55 = vmul.f32 %v728_v46, %v576_v51 }
  0xf2   : > { %v563_v57 = vadd.f32 %v726_v45, %v562_v52 }
  0xf3   : > { %v578_v59 = vadd.f32 %v728_v46, %v577_v55 }
  0xf4   : > { %v567_v60 = vsel %vm566_vm6, %v726_v45, %v563_v57 }
  0xf5   : > { %v572_v62 = vsel %vm569_vm8, %v571_v58, %v567_v60  ;;  %v582_v63 = vsel %vm581_vm9, %v728_v46, %v578_v59 }
  0xf6   : > { %v587_v2 = vsel %vm584_vm10, %v586_v61, %v582_v63  ;;  %v589_v3 = vmul.f32 %v572_v62, %v549_v38 }
  0xf7   : > { %v590_v4 = vmul.f32 %v587_v2, %v550_v24 }
  0xf8   : > { %591 = vst [vmem:[%s271_s20] sm:$0xff] %v589_v3 }
  0xf9   : > { %592 = vst [vmem:[%s271_s20 + $0x8] sm:$0xff] %v590_v4 }
  0xfa PF: > { %s16_s21 = sadd.s32 1, %s735_s21  }
  0xfb   : > { %p13_p4 = scmp.ge.s32.totalorder %s16_s21, 4  }
  0xfd   :  { %15 = sbr.rel (!%p13_p4) target bundleno = 1 (0x1), region = 80 }

</bundles_post_ra>
